<compile_context>
chip_gen: v6e
topology: v6e:2x2x1
jax: 0.10.0
libtpu: 0.0.40
codegen_flags: <defaults>
</compile_context>

<pallas_src>
import functools

import numpy as np
import jax
import jax.numpy as jnp
from jax.experimental import pallas as pl
from jax.experimental.pallas import tpu as pltpu

LANE = 128      # TPU lane width; also hidden width and padded per-buchi width
HIDDEN = 128


# ----------------------------- Pallas kernels ------------------------------

def _mlp_q(xp_ref, w12_ref, w3_ref, bias_ref):
    """Shared 3-layer MLP body on the padded (B,128) activation.

    xp_ref  : (B, 128)             f32 VMEM scratch (state zero-padded along K)
    w12_ref : (256, 128)           bf16  rows 0:128 = padded w1, 128:256 = w2
    w3_ref  : (128, n_buchi*128)   bf16  lane-dense zero-padded per-buchi slabs
    bias_ref: (1, 256+n_buchi*128) f32   [b1 | b2 | padded b3]
    returns : (B, n_buchi*128)     f32
    """
    x = xp_ref[...].astype(jnp.bfloat16)
    h1 = jnp.dot(x, w12_ref[0:LANE, :], preferred_element_type=jnp.float32)
    h1 = jnp.maximum(h1 + bias_ref[:, 0:LANE], 0.0)          # f32 VPU epilogue
    h2 = jnp.dot(h1.astype(jnp.bfloat16), w12_ref[LANE:2 * LANE, :],
                 preferred_element_type=jnp.float32)
    h2 = jnp.maximum(h2 + bias_ref[:, LANE:2 * LANE], 0.0)
    q = jnp.dot(h2.astype(jnp.bfloat16), w3_ref[...],
                preferred_element_type=jnp.float32)
    return q + bias_ref[:, 2 * LANE:]


def _pad_state(x_ref, xp_ref, mdp_dim):
    # In-kernel K-padding: zero the (B,128) scratch (avoids 0*NaN from stale
    # VMEM, and the zero rows of w1 annihilate the padded lanes anyway), then
    # masked-store the mdp_dim real lanes.
    xp_ref[...] = jnp.zeros_like(xp_ref)
    xp_ref[:, :mdp_dim] = x_ref[...]


def _dqn_forward_kernel(x_ref, buchi_ref, mask_ref, w12_ref, w3_ref, bias_ref,
                        q_ref, m_ref, xp_ref, *, n_buchi, mdp_dim):
    """Fused MLP + per-row buchi gather (batched forward path).

    x_ref    : (B, mdp_dim)   f32
    buchi_ref: (B, 1)         i32
    mask_ref : (n_buchi, 128) f32  (1.0 valid / 0.0 invalid-or-pad)
    q_ref    : (B, 128)       f32  selected Q row (lane-dense, padded cols = 0)
    m_ref    : (B, 128)       f32  selected mask row
    """
    _pad_state(x_ref, xp_ref, mdp_dim)
    q = _mlp_q(xp_ref, w12_ref, w3_ref, bias_ref)              # (B, n_buchi*128)

    b = buchi_ref[...]                                         # (B, 1) i32
    B = q.shape[0]
    q_sel = jnp.zeros((B, LANE), jnp.float32)
    m_sel = jnp.zeros((B, LANE), jnp.float32)
    # n_buchi is tiny and static: unrolled, lane-aligned selects on the VPU.
    # TODO(synk): a buchi index outside [0, n_buchi) silently yields zeros
    # (PyTorch indexing would raise); add pl.debug_check if stricter behavior
    # is ever needed.
    for g in range(n_buchi):
        pred = b == g
        q_sel = jnp.where(pred, q[:, g * LANE:(g + 1) * LANE], q_sel)
        m_sel = jnp.where(pred, mask_ref[g:g + 1, :], m_sel)

    q_ref[...] = q_sel
    m_ref[...] = m_sel


def _dqn_act_kernel(x_ref, buchi_ref, mask_ref, w12_ref, w3_ref, bias_ref,
                    a_ref, xp_ref, *, n_buchi, mdp_dim):
    """Fused MLP + buchi gather + mask(-inf) + argmax for the B=1 act() path.

    a_ref: (1, 1) i32  -- greedy action index.
    """
    _pad_state(x_ref, xp_ref, mdp_dim)
    q = _mlp_q(xp_ref, w12_ref, w3_ref, bias_ref)              # (1, n_buchi*128)

    b = buchi_ref[...]                                         # (1, 1) i32
    q_sel = jnp.full((1, LANE), -jnp.inf, jnp.float32)
    for g in range(n_buchi):
        pred = b == g
        qg = jnp.where(mask_ref[g:g + 1, :] > 0.5,
                       q[:, g * LANE:(g + 1) * LANE], -jnp.inf)
        q_sel = jnp.where(pred, qg, q_sel)

    # First-index argmax via max + iota + min (pure VPU/XLU ops).
    idx = jax.lax.broadcasted_iota(jnp.int32, (1, LANE), 1)
    mx = jnp.max(q_sel, axis=1, keepdims=True)
    cand = jnp.where(q_sel >= mx, idx, LANE)
    a_ref[...] = jnp.min(cand, axis=1, keepdims=True)


def dqn_forward_pallas(x, buchi, mask_pad, w12, w3, bias, *, n_buchi, mdp_dim):
    """Single-launch batched forward kernel; whole problem resident in VMEM.

    TODO(synk): if batch size grows beyond toy sizes, add a batch grid with
    dimension_semantics=("parallel",) to shard across v7x's 2 TensorCores
    (Bt=256 on v6e/v7x, 128 on v5e to fill the MXU); weights stay whole-array.
    """
    B = x.shape[0]
    vmem = pl.BlockSpec(memory_space=pltpu.MemorySpace.VMEM)
    kernel = functools.partial(_dqn_forward_kernel, n_buchi=n_buchi,
                               mdp_dim=mdp_dim)
    return pl.pallas_call(
        kernel,
        out_shape=(jax.ShapeDtypeStruct((B, LANE), jnp.float32),
                   jax.ShapeDtypeStruct((B, LANE), jnp.float32)),
        in_specs=[vmem] * 6,
        out_specs=(vmem, vmem),
        scratch_shapes=[pltpu.VMEM((B, LANE), jnp.float32)],
    )(x, buchi, mask_pad, w12, w3, bias)


def dqn_act_pallas(x, buchi, mask_pad, w12, w3, bias, *, n_buchi, mdp_dim):
    """Single-launch B=1 act kernel: MLP + gather + mask + argmax fused.

    TODO(synk): a PrefetchScalarGridSpec with buchi as the prefetch scalar
    could DMA only the selected (128,128) w3 slab; skipped here since the path
    is launch-bound and the win is modest.
    """
    vmem = pl.BlockSpec(memory_space=pltpu.MemorySpace.VMEM)
    kernel = functools.partial(_dqn_act_kernel, n_buchi=n_buchi,
                               mdp_dim=mdp_dim)
    return pl.pallas_call(
        kernel,
        out_shape=jax.ShapeDtypeStruct((1, 1), jnp.int32),
        in_specs=[vmem] * 6,
        out_specs=vmem,
        scratch_shapes=[pltpu.VMEM((1, LANE), jnp.float32)],
    )(x, buchi, mask_pad, w12, w3, bias)


# --------------------------- DQN module (JAX) ------------------------------

class DQNPallas:
    """JAX/Pallas port of the PyTorch DQN module's forward/act pass."""

    def __init__(self, mdp_dim, n_buchi, n_total_actions, n_mdp_actions,
                 gamma=0.99, key=jax.random.PRNGKey(0)):
        self.shp = (n_buchi, n_total_actions)
        self.n_mdp_actions = n_mdp_actions
        self.gamma = gamma
        self.mdp_dim = mdp_dim

        out_flat = n_buchi * n_total_actions

        def init_linear(k, fan_in, fan_out):
            # PyTorch nn.Linear default init: U(-1/sqrt(fan_in), 1/sqrt(fan_in))
            kw, kb = jax.random.split(k)
            bound = 1.0 / jnp.sqrt(fan_in)
            w = jax.random.uniform(kw, (fan_in, fan_out), jnp.float32,
                                   -bound, bound)
            b = jax.random.uniform(kb, (1, fan_out), jnp.float32,
                                   -bound, bound)
            return w, b

        k1, k2, k3 = jax.random.split(key, 3)
        w1, b1 = init_linear(k1, mdp_dim, HIDDEN)
        w2, b2 = init_linear(k2, HIDDEN, HIDDEN)
        w3, b3 = init_linear(k3, HIDDEN, out_flat)

        # ---- packed operand 1: w1|w2 slab (256,128) bf16, w1 K-padded to 128.
        w12 = jnp.zeros((2 * LANE, HIDDEN), jnp.float32)
        w12 = w12.at[:mdp_dim, :].set(w1)
        w12 = w12.at[LANE:2 * LANE, :].set(w2)
        self.w12 = w12.astype(jnp.bfloat16)

        # ---- packed operand 2: lane-dense final layer, one zero-padded
        # 128-wide slab per buchi state (gather = static aligned slice+select).
        w3p = jnp.zeros((HIDDEN, n_buchi, LANE), jnp.float32)
        w3p = w3p.at[:, :, :n_total_actions].set(
            w3.reshape(HIDDEN, n_buchi, n_total_actions))
        self.w3 = w3p.reshape(HIDDEN, n_buchi * LANE).astype(jnp.bfloat16)

        # ---- packed operand 3: all biases in one f32 slab [b1 | b2 | b3pad].
        b3p = jnp.zeros((1, n_buchi, LANE), jnp.float32)
        b3p = b3p.at[:, :, :n_total_actions].set(
            b3.reshape(1, n_buchi, n_total_actions))
        bias = jnp.zeros((1, 2 * LANE + n_buchi * LANE), jnp.float32)
        bias = bias.at[:, :LANE].set(b1)
        bias = bias.at[:, LANE:2 * LANE].set(b2)
        bias = bias.at[:, 2 * LANE:].set(b3p.reshape(1, n_buchi * LANE))
        self.bias = bias

        # Action mask, same construction as the PyTorch __init__
        # (eps = total - 1 in this synthetic setup, no per-buchi eps actions).
        mask = jnp.ones((n_buchi, n_total_actions), dtype=bool)
        if n_total_actions != n_mdp_actions:
            eps = n_total_actions - 1
            mask = mask.at[:, eps:].set(False)
        self.mask = mask
        self.mask_pad = jnp.zeros((n_buchi, LANE), jnp.float32).at[
            :, :n_total_actions].set(mask.astype(jnp.float32))

        # One jitted device computation per entry point (one launch, one sync).
        self._forward_jit = jax.jit(self._forward_core)
        self._act_jit = jax.jit(self._act_core)

    # ------------------------- jitted device cores -------------------------

    def _forward_core(self, state, buchi_flat):
        n_buchi, n_act = self.shp
        q_sel, m_sel = dqn_forward_pallas(
            state, buchi_flat, self.mask_pad, self.w12, self.w3, self.bias,
            n_buchi=n_buchi, mdp_dim=self.mdp_dim)
        return q_sel[:, :n_act], m_sel[:, :n_act] > 0.5

    def _act_core(self, state, buchi_scalar):
        buchi_flat = jnp.reshape(buchi_scalar, (1, 1)).astype(jnp.int32)
        a = dqn_act_pallas(
            state, buchi_flat, self.mask_pad, self.w12, self.w3, self.bias,
            n_buchi=self.shp[0], mdp_dim=self.mdp_dim)
        return a[0, 0]

    # ------------------------------ public API -----------------------------

    def forward(self, state, buchi, to_mask=True):
        """state: (B, mdp_dim) f32; buchi: (B, 1, 1) int32.

        Returns (qs, valid_mask) with qs of shape (B, n_total_actions).
        """
        buchi_flat = buchi.reshape(buchi.shape[0], 1).astype(jnp.int32)
        qs, sel_mask = self._forward_jit(state, buchi_flat)
        if to_mask:
            # TODO(synk): torch.masked.MaskedTensor has no JAX/Pallas
            # equivalent; return the values together with the boolean mask.
            return qs, sel_mask
        return qs, None

    def act(self, state, buchi_state):
        """state: (1, mdp_dim); buchi_state: python int."""
        # TODO(synk): the int() below is the single per-step host sync; batch
        # rollout steps with lax.scan on device (or vectorized envs) to
        # amortize launch + weight-DMA overhead across many environment steps.
        a = int(self._act_jit(state, jnp.int32(buchi_state)))
        is_eps = a >= self.n_mdp_actions
        return a, bool(is_eps), 0

    def random_act(self, state, buchi_state):
        # Host-side RNG like the original; no kernel involved.
        valid = np.asarray(self.mask[buchi_state])
        choices = np.nonzero(valid)[0]
        act = int(np.random.choice(choices))
        return act, act >= self.n_mdp_actions, 0


# --------------------------------- main ------------------------------------

if __name__ == "__main__":
    # mdp observation dim = 4, buchi states = 3, total actions = 6
    # (4 mdp actions + eps actions), batch = 8.
    B, MDP_DIM, N_BUCHI, N_TOTAL, N_MDP = 8, 4, 3, 6, 4

    key = jax.random.PRNGKey(0)
    k_state, k_buchi, k_params = jax.random.split(key, 3)

    model = DQNPallas(MDP_DIM, N_BUCHI, N_TOTAL, N_MDP, gamma=0.99,
                      key=k_params)

    state = jax.random.normal(k_state, (B, MDP_DIM), dtype=jnp.float32)
    buchi = jax.random.randint(k_buchi, (B, 1, 1), 0, N_BUCHI,
                               dtype=jnp.int32)

    qs, sel_mask = model.forward(state, buchi, to_mask=True)
    qs = jax.block_until_ready(qs)
    sel_mask = jax.block_until_ready(sel_mask)
    assert qs.shape == (B, N_TOTAL)
    assert sel_mask.shape == (B, N_TOTAL)

    # Reference in plain JAX mirroring the kernel math (bf16 MXU dots with f32
    # accumulation / epilogue), validating padding + packing + fused gather.
    def ref_forward(x, buchi_idx):
        w1 = model.w12[:LANE]
        w2 = model.w12[LANE:]
        b1 = model.bias[:, :LANE]
        b2 = model.bias[:, LANE:2 * LANE]
        b3 = model.bias[:, 2 * LANE:]
        x_pad = jnp.pad(x, ((0, 0), (0, LANE - x.shape[1])))
        h1 = jnp.maximum(
            jnp.dot(x_pad.astype(jnp.bfloat16), w1,
                    preferred_element_type=jnp.float32) + b1, 0.0)
        h2 = jnp.maximum(
            jnp.dot(h1.astype(jnp.bfloat16), w2,
                    preferred_element_type=jnp.float32) + b2, 0.0)
        q = jnp.dot(h2.astype(jnp.bfloat16), model.w3,
                    preferred_element_type=jnp.float32) + b3
        q = q.reshape(x.shape[0], N_BUCHI, LANE)[:, :, :N_TOTAL]
        idx = jnp.broadcast_to(buchi_idx.reshape(-1, 1, 1).astype(jnp.int32),
                               (x.shape[0], 1, N_TOTAL))
        return jnp.take_along_axis(q, idx, axis=1).squeeze(1)

    buchi_idx = buchi.reshape(B)
    ref_qs = ref_forward(state, buchi_idx)
    assert jnp.allclose(qs, ref_qs, atol=1e-3, rtol=1e-3), (
        float(jnp.max(jnp.abs(qs - ref_qs))))
    assert bool(jnp.array_equal(sel_mask, model.mask[buchi_idx]))

    # Exercise the act() path: fused in-kernel mask + argmax must agree with a
    # host-side argmax over the (identically computed) forward Q row.
    test_buchi = 1
    q1, m1 = model.forward(state[:1],
                           jnp.full((1, 1, 1), test_buchi, jnp.int32))
    a, is_eps, _ = model.act(state[:1], test_buchi)
    masked1 = np.where(np.asarray(m1[0]), np.asarray(q1[0]), -np.inf)
    assert 0 <= a < N_TOTAL
    assert a == int(np.argmax(masked1))
    assert is_eps == (a >= N_MDP)
    assert isinstance(is_eps, bool)

    print("KERNEL_OK")
</pallas_src>

<mosaic_0001>
module attributes {stable_mosaic.version = 11 : i64} {
  func.func @_dqn_forward_kernel(%arg0: memref<8x4xf32, #tpu.memory_space<vmem>>, %arg1: memref<8x1xi32, #tpu.memory_space<vmem>>, %arg2: memref<3x128xf32, #tpu.memory_space<vmem>>, %arg3: memref<256x128xbf16, #tpu.memory_space<vmem>>, %arg4: memref<128x384xbf16, #tpu.memory_space<vmem>>, %arg5: memref<1x640xf32, #tpu.memory_space<vmem>>, %arg6: memref<8x128xf32, #tpu.memory_space<vmem>>, %arg7: memref<8x128xf32, #tpu.memory_space<vmem>>, %arg8: memref<8x128xf32, #tpu.memory_space<vmem>>) attributes {dimension_semantics = [], scalar_prefetch = 0 : i64, scratch_operands = 1 : i64, tpu.core_type = #tpu.core_type<tc>} {
    %cst = arith.constant 0.000000e+00 : f32
    %0 = vector.broadcast %cst : f32 to vector<8x128xf32>
    %c0 = arith.constant 0 : index
    %c0_0 = arith.constant 0 : index
    %1 = vector.load %arg8[%c0, %c0_0] : memref<8x128xf32, #tpu.memory_space<vmem>>, vector<8x128xf32>
    tpu.vector_store %arg8[%c0, %c0_0], %0 {strides = array<i32>} : memref<8x128xf32, #tpu.memory_space<vmem>>, vector<8x128xf32>,
    %c0_1 = arith.constant 0 : index
    %c0_2 = arith.constant 0 : index
    %2 = vector.load %arg0[%c0_1, %c0_2] : memref<8x4xf32, #tpu.memory_space<vmem>>, vector<8x4xf32>
    %c0_3 = arith.constant 0 : index
    %c0_4 = arith.constant 0 : index
    %3 = vector.load %arg8[%c0_3, %c0_4] : memref<8x128xf32, #tpu.memory_space<vmem>>, vector<8x4xf32>
    tpu.vector_store %arg8[%c0_3, %c0_4], %2 {strides = array<i32>} : memref<8x128xf32, #tpu.memory_space<vmem>>, vector<8x4xf32>,
    %c0_5 = arith.constant 0 : index
    %c0_6 = arith.constant 0 : index
    %4 = vector.load %arg8[%c0_5, %c0_6] : memref<8x128xf32, #tpu.memory_space<vmem>>, vector<8x128xf32>
    %5 = arith.truncf %4 : vector<8x128xf32> to vector<8x128xbf16>
    %c0_7 = arith.constant 0 : index
    %c0_8 = arith.constant 0 : index
    %6 = vector.load %arg3[%c0_7, %c0_8] : memref<256x128xbf16, #tpu.memory_space<vmem>>, vector<128x128xbf16>
    %cst_9 = arith.constant dense<0.000000e+00> : vector<8x128xf32>
    %7 = tpu.matmul %5, %6, %cst_9 {dimension_numbers = #tpu.dot_dimension_numbers<[1], [0], [0], [1], [0, 0, 1, 1], [], []>} : vector<8x128xbf16>, vector<128x128xbf16>, vector<8x128xf32> -> vector<8x128xf32>
    %c0_10 = arith.constant 0 : index
    %c0_11 = arith.constant 0 : index
    %8 = vector.load %arg5[%c0_10, %c0_11] : memref<1x640xf32, #tpu.memory_space<vmem>>, vector<1x128xf32>
    %9 = vector.broadcast %8 : vector<1x128xf32> to vector<8x128xf32>
    %10 = arith.addf %7, %9 : vector<8x128xf32>
    %cst_12 = arith.constant 0.000000e+00 : f32
    %11 = vector.broadcast %cst_12 : f32 to vector<8x128xf32>
    %12 = arith.maximumf %10, %11 : vector<8x128xf32>
    %13 = arith.truncf %12 : vector<8x128xf32> to vector<8x128xbf16>
    %c128 = arith.constant 128 : index
    %c0_13 = arith.constant 0 : index
    %14 = vector.load %arg3[%c128, %c0_13] : memref<256x128xbf16, #tpu.memory_space<vmem>>, vector<128x128xbf16>
    %cst_14 = arith.constant dense<0.000000e+00> : vector<8x128xf32>
    %15 = tpu.matmul %13, %14, %cst_14 {dimension_numbers = #tpu.dot_dimension_numbers<[1], [0], [0], [1], [0, 0, 1, 1], [], []>} : vector<8x128xbf16>, vector<128x128xbf16>, vector<8x128xf32> -> vector<8x128xf32>
    %c0_15 = arith.constant 0 : index
    %c128_16 = arith.constant 128 : index
    %16 = vector.load %arg5[%c0_15, %c128_16] : memref<1x640xf32, #tpu.memory_space<vmem>>, vector<1x128xf32>
    %17 = vector.broadcast %16 : vector<1x128xf32> to vector<8x128xf32>
    %18 = arith.addf %15, %17 : vector<8x128xf32>
    %cst_17 = arith.constant 0.000000e+00 : f32
    %19 = vector.broadcast %cst_17 : f32 to vector<8x128xf32>
    %20 = arith.maximumf %18, %19 : vector<8x128xf32>
    %21 = arith.truncf %20 : vector<8x128xf32> to vector<8x128xbf16>
    %c0_18 = arith.constant 0 : index
    %c0_19 = arith.constant 0 : index
    %22 = vector.load %arg4[%c0_18, %c0_19] : memref<128x384xbf16, #tpu.memory_space<vmem>>, vector<128x384xbf16>
    %cst_20 = arith.constant dense<0.000000e+00> : vector<8x384xf32>
    %23 = tpu.matmul %21, %22, %cst_20 {dimension_numbers = #tpu.dot_dimension_numbers<[1], [0], [0], [1], [0, 0, 1, 1], [], []>} : vector<8x128xbf16>, vector<128x384xbf16>, vector<8x384xf32> -> vector<8x384xf32>
    %c0_21 = arith.constant 0 : index
    %c256 = arith.constant 256 : index
    %24 = vector.load %arg5[%c0_21, %c256] : memref<1x640xf32, #tpu.memory_space<vmem>>, vector<1x384xf32>
    %25 = vector.broadcast %24 : vector<1x384xf32> to vector<8x384xf32>
    %26 = arith.addf %23, %25 : vector<8x384xf32>
    %c0_22 = arith.constant 0 : index
    %c0_23 = arith.constant 0 : index
    %27 = vector.load %arg1[%c0_22, %c0_23] : memref<8x1xi32, #tpu.memory_space<vmem>>, vector<8x1xi32>
    %cst_24 = arith.constant 0.000000e+00 : f32
    %28 = vector.broadcast %cst_24 : f32 to vector<8x128xf32>
    %cst_25 = arith.constant 0.000000e+00 : f32
    %29 = vector.broadcast %cst_25 : f32 to vector<8x128xf32>
    %c0_i32 = arith.constant 0 : i32
    %30 = vector.broadcast %c0_i32 : i32 to vector<8x1xi32>
    %31 = arith.cmpi eq, %27, %30 : vector<8x1xi32>
    %32 = vector.extract_strided_slice %26 {offsets = [0, 0], sizes = [8, 128], strides = [1, 1]} : vector<8x384xf32> to vector<8x128xf32>
    %33 = vector.shape_cast %31 : vector<8x1xi1> to vector<8x1xi1>
    %34 = vector.broadcast %33 : vector<8x1xi1> to vector<8x128xi1>
    %35 = arith.select %34, %32, %28 : vector<8x128xi1>, vector<8x128xf32>
    %c0_26 = arith.constant 0 : index
    %c0_27 = arith.constant 0 : index
    %36 = vector.load %arg2[%c0_26, %c0_27] : memref<3x128xf32, #tpu.memory_space<vmem>>, vector<1x128xf32>
    %37 = vector.shape_cast %31 : vector<8x1xi1> to vector<8x1xi1>
    %38 = vector.broadcast %37 : vector<8x1xi1> to vector<8x128xi1>
    %39 = vector.shape_cast %36 : vector<1x128xf32> to vector<1x128xf32>
    %40 = vector.broadcast %39 : vector<1x128xf32> to vector<8x128xf32>
    %41 = arith.select %38, %40, %29 : vector<8x128xi1>, vector<8x128xf32>
    %c1_i32 = arith.constant 1 : i32
    %42 = vector.broadcast %c1_i32 : i32 to vector<8x1xi32>
    %43 = arith.cmpi eq, %27, %42 : vector<8x1xi32>
    %44 = vector.extract_strided_slice %26 {offsets = [0, 128], sizes = [8, 128], strides = [1, 1]} : vector<8x384xf32> to vector<8x128xf32>
    %45 = vector.shape_cast %43 : vector<8x1xi1> to vector<8x1xi1>
    %46 = vector.broadcast %45 : vector<8x1xi1> to vector<8x128xi1>
    %47 = arith.select %46, %44, %35 : vector<8x128xi1>, vector<8x128xf32>
    %c1 = arith.constant 1 : index
    %c0_28 = arith.constant 0 : index
    %48 = vector.load %arg2[%c1, %c0_28] : memref<3x128xf32, #tpu.memory_space<vmem>>, vector<1x128xf32>
    %49 = vector.shape_cast %43 : vector<8x1xi1> to vector<8x1xi1>
    %50 = vector.broadcast %49 : vector<8x1xi1> to vector<8x128xi1>
    %51 = vector.shape_cast %48 : vector<1x128xf32> to vector<1x128xf32>
    %52 = vector.broadcast %51 : vector<1x128xf32> to vector<8x128xf32>
    %53 = arith.select %50, %52, %41 : vector<8x128xi1>, vector<8x128xf32>
    %c2_i32 = arith.constant 2 : i32
    %54 = vector.broadcast %c2_i32 : i32 to vector<8x1xi32>
    %55 = arith.cmpi eq, %27, %54 : vector<8x1xi32>
    %56 = vector.extract_strided_slice %26 {offsets = [0, 256], sizes = [8, 128], strides = [1, 1]} : vector<8x384xf32> to vector<8x128xf32>
    %57 = vector.shape_cast %55 : vector<8x1xi1> to vector<8x1xi1>
    %58 = vector.broadcast %57 : vector<8x1xi1> to vector<8x128xi1>
    %59 = arith.select %58, %56, %47 : vector<8x128xi1>, vector<8x128xf32>
    %c2 = arith.constant 2 : index
    %c0_29 = arith.constant 0 : index
    %60 = vector.load %arg2[%c2, %c0_29] : memref<3x128xf32, #tpu.memory_space<vmem>>, vector<1x128xf32>
    %61 = vector.shape_cast %55 : vector<8x1xi1> to vector<8x1xi1>
    %62 = vector.broadcast %61 : vector<8x1xi1> to vector<8x128xi1>
    %63 = vector.shape_cast %60 : vector<1x128xf32> to vector<1x128xf32>
    %64 = vector.broadcast %63 : vector<1x128xf32> to vector<8x128xf32>
    %65 = arith.select %62, %64, %53 : vector<8x128xi1>, vector<8x128xf32>
    %c0_30 = arith.constant 0 : index
    %c0_31 = arith.constant 0 : index
    %66 = vector.load %arg6[%c0_30, %c0_31] : memref<8x128xf32, #tpu.memory_space<vmem>>, vector<8x128xf32>
    tpu.vector_store %arg6[%c0_30, %c0_31], %59 {strides = array<i32>} : memref<8x128xf32, #tpu.memory_space<vmem>>, vector<8x128xf32>,
    %c0_32 = arith.constant 0 : index
    %c0_33 = arith.constant 0 : index
    %67 = vector.load %arg7[%c0_32, %c0_33] : memref<8x128xf32, #tpu.memory_space<vmem>>, vector<8x128xf32>
    tpu.vector_store %arg7[%c0_32, %c0_33], %65 {strides = array<i32>} : memref<8x128xf32, #tpu.memory_space<vmem>>, vector<8x128xf32>,
    return
  }
}

</mosaic_0001>

<bundles_post_ra>
// kernel: _forward_core.1
= control target key start
LH: loop header
LB: loop body
LE: loop exit
PB: predicated region body
PF: predicated region fallthrough
CT: control target
= control target key end

     0   :  { %13 = vsyncpa [#allocation4], 0  ;;  %s988_s0 = inlined_call_operand.vmem [shape: f32[8,4], index: 0, kind: input, shape index: {}]   ;;  %s989_s1 = inlined_call_operand.vmem [shape: s32[8,1], index: 1, kind: input, shape index: {}]   ;;  %s990_s2 = inlined_call_operand.vmem [shape: f32[3,128], index: 2, kind: input, shape index: {}]   ;;  %s991_s3 = inlined_call_operand.hbm [shape: bf16[256,128], index: 3, kind: input, shape index: {}]   ;;  %s992_s4 = inlined_call_operand.hbm [shape: bf16[128,384], index: 4, kind: input, shape index: {}]   ;;  %s993_s5 = inlined_call_operand.vmem [shape: f32[1,640], index: 5, kind: input, shape index: {}]   ;;  %s994_s6 = inlined_call_operand.hbm [shape: f32[8,128], index: 6, kind: output, shape index: {0}]   ;;  %s995_s7 = inlined_call_operand.vmem [shape: f32[8,128], index: 7, kind: output, shape index: {1}]  }
   0x1   :  { %14 = vsyncpa [#allocation7], 0 }
   0x2   :  { %15 = vsyncpa [#allocation5], 0  ;;  %s865_s24 = smov [#allocation3]  }
   0x3   :  { %s27_s25 = sshll.u32 %s865_s24, 4  ;;  %s28_s25 = int_to_ptr.vmem [resolvable:$true] %s27_s25 }
   0x4   :  { %s807_s26 = scalar_lea.vmem %s28_s25, 2048  ;;  %p812_p1 = scmp.lt.s32.totalorder %s28_s25, %s28_s25 }
   0x5   :  { %p808_p0 = scmp.ne.s32.totalorder %s28_s25, %s807_s26  ;;  %p813_p2 = scmp.lt.s32.totalorder %s807_s26, %s807_s26 }
   0x7   :  { %p814_p3 = por %p813_p2, %p812_p1 }
   0x9   :  { %p815_p4 = pnand %p814_p3, %p808_p0 }
   0xb   :  { %818 = shalt.err (!%p815_p4)
}
   0xc   :  { %s866_s27 = smov 64   ;;  %s867_s28 = smov 4  }
   0xd   :  { %33 = dma.hbm_to_vmem [thread:$0]  %s991_s3, 2048, %s28_s25, [#allocation4], %s866_s27, %s866_s27, %s867_s28  }
   0xe   :  { %s868_s8 = smov [#allocation6]  }
   0xf   :  { %s39_s9 = sshll.u32 %s868_s8, 4  ;;  %s40_s9 = int_to_ptr.vmem [resolvable:$true] %s39_s9 }
  0x10   :  { %s827_s10 = scalar_lea.vmem %s40_s9, 3072  ;;  %p832_p6 = scmp.lt.s32.totalorder %s40_s9, %s40_s9 }
  0x11   :  { %p828_p5 = scmp.ne.s32.totalorder %s40_s9, %s827_s10  ;;  %p833_p7 = scmp.lt.s32.totalorder %s827_s10, %s827_s10 }
  0x13   :  { %p834_p8 = por %p833_p7, %p832_p6 }
  0x15   :  { %p835_p9 = pnand %p834_p8, %p828_p5 }
  0x17   :  { %838 = shalt.err (!%p835_p9)
}
  0x18   :  { %s869_s11 = smov 192   ;;  %s870_s12 = smov 12  }
  0x19   :  { %45 = dma.hbm_to_vmem [thread:$0]  %s992_s4, 3072, %s40_s9, [#allocation7], %s869_s11, %s869_s11, %s870_s12  }
  0x1a   :  { %859 = dma.done.wait [#allocation4], 2048  }
  0x1b   :  { %860 = vsyncadd [#allocation4], 4294965248 }
  0x1c   :  { %861 = dma.done.wait [#allocation7], 3072  }
  0x1d   :  { %862 = vsyncadd [#allocation7], 4294964224  ;;  %v871_v0 = vmov 0.0   ;;  %vm872_vm0 = vmmov 0   ;;  %v751_v1 = vld [vmem:[#allocation3 + $0x38] sm:$0xff]   ;;  %v752_v2 = vld [vmem:[#allocation3 + $0x30] sm:$0xff]  }
  0x1e   :  { %679 = vmatprep.subr.bf16.mxu0 %v871_v0  ;;  %55 = vst [vmem:[#allocation2] sm:$0xff] %v871_v0  ;;  %695 = vmatprep.mubr.msk.bf16.mxu0 %vm872_vm0, %v871_v0  ;;  %v753_v3 = vld [vmem:[#allocation3 + $0x28] sm:$0xff]   ;;  %vm57_vm1 = vcmask 31744   ;;  %v56_v4 = vld [vmem:[%s988_s0] sm:$0xff]  ;;  %v754_v6 = vld [vmem:[#allocation3 + $0x20] sm:$0xff]   ;;  %v873_v52 = vmov 0  }
  0x1f   :  { %699 = vmatprep.subr.bf16.mxu1 %v871_v0  ;;  %715 = vmatprep.mubr.msk.bf16.mxu1 %vm872_vm0, %v871_v0  ;;  %58 = vst.msk [vmem:[#allocation2] sm:$0xff] %vm57_vm1, %v56_v4  ;;  %v759_v5 = vld [vmem:[#allocation3 + $0x78] sm:$0xff]   ;;  %v760_v7 = vld [vmem:[#allocation3 + $0x70] sm:$0xff]   ;;  %v761_v9 = vld [vmem:[#allocation3 + $0x68] sm:$0xff]  }
  0x20   :  { %680 = vmatpush3.bf16.msra.mxu0 %v751_v1  ;;  %700 = vmatpush3.bf16.msra.mxu1 %v759_v5  ;;  %v755_v8 = vld [vmem:[#allocation3 + $0x18] sm:$0xff]   ;;  %v756_v10 = vld [vmem:[#allocation3 + $0x10] sm:$0xff]   ;;  %v762_v11 = vld [vmem:[#allocation3 + $0x60] sm:$0xff]  }
  0x21   :  { %681 = vmatprep.subr.bf16.mxu0 %v871_v0  ;;  %701 = vmatprep.subr.bf16.mxu1 %v871_v0  ;;  %v757_v12 = vld [vmem:[#allocation3 + $0x8] sm:$0xff]   ;;  %v763_v13 = vld [vmem:[#allocation3 + $0x58] sm:$0xff]   ;;  %v758_v14 = vld [vmem:[#allocation3] sm:$0xff]  }
  0x22   :  { %v764_v16 = vld [vmem:[#allocation3 + $0x50] sm:$0xff]   ;;  %v765_v18 = vld [vmem:[#allocation3 + $0x48] sm:$0xff]   ;;  %v766_v19 = vld [vmem:[#allocation3 + $0x40] sm:$0xff]   ;;  %749 = vset.pattern.permute.xlu0 %v873_v52  ;;  %750 = vset.pattern.permute.xlu1 %v873_v52 }
  0x23   :  { %v767_v20 = vld [vmem:[#allocation6 + $0xa8] ss:$12 sps:$4 sm:$0xff]   ;;  %v769_v21 = vld [vmem:[#allocation6 + $0xac] ss:$12 sps:$4 sm:$0xff]   ;;  %v771_v23 = vld [vmem:[#allocation6 + $0x90] ss:$12 sps:$4 sm:$0xff]  }
  0x24   :  { %682 = vmatpush3.bf16.msra.mxu0 %v752_v2  ;;  %702 = vmatpush3.bf16.msra.mxu1 %v760_v7  ;;  %v773_v22 = vld [vmem:[#allocation6 + $0x94] ss:$12 sps:$4 sm:$0xff]   ;;  %v777_v24 = vld [vmem:[#allocation6 + $0x7c] ss:$12 sps:$4 sm:$0xff]   ;;  %v775_v25 = vld [vmem:[#allocation6 + $0x78] ss:$12 sps:$4 sm:$0xff]  }
  0x25   :  { %683 = vmatprep.subr.bf16.mxu0 %v871_v0  ;;  %703 = vmatprep.subr.bf16.mxu1 %v871_v0  ;;  %v781_v26 = vld [vmem:[#allocation6 + $0x64] ss:$12 sps:$4 sm:$0xff]   ;;  %v779_v27 = vld [vmem:[#allocation6 + $0x60] ss:$12 sps:$4 sm:$0xff]   ;;  %v783_v29 = vld [vmem:[#allocation6 + $0x48] ss:$12 sps:$4 sm:$0xff]  }
  0x26   :  { %v59_v15 = vld [vmem:[#allocation2] sm:$0xff]  ;;  %v789_v30 = vld [vmem:[#allocation6 + $0x34] ss:$12 sps:$4 sm:$0xff]   ;;  %v797_v49 = vld [vmem:[#allocation6 + $0x4] ss:$12 sps:$4 sm:$0xff]  }
  0x27   :  { %v60_v17 = vpack.c.bf16 %v59_v15, %v59_v15  ;;  %v785_v28 = vld [vmem:[#allocation6 + $0x4c] ss:$12 sps:$4 sm:$0xff]   ;;  %v787_v31 = vld [vmem:[#allocation6 + $0x30] ss:$12 sps:$4 sm:$0xff]   ;;  %v782_v45 = vld [vmem:[#allocation6 + $0x68] ss:$12 sps:$4 sm:$0xff]  }
  0x28   :  { %684 = vmatpush3.bf16.msra.mxu0 %v753_v3  ;;  %704 = vmatpush3.bf16.msra.mxu1 %v761_v9  ;;  %v793_v32 = vld [vmem:[#allocation6 + $0x1c] ss:$12 sps:$4 sm:$0xff]   ;;  %v791_v33 = vld [vmem:[#allocation6 + $0x18] ss:$12 sps:$4 sm:$0xff]   ;;  %v778_v44 = vld [vmem:[#allocation6 + $0x80] ss:$12 sps:$4 sm:$0xff]  }
  0x29   :  { %685 = vmatprep.subr.bf16.mxu0 %v871_v0  ;;  %705 = vmatprep.subr.bf16.mxu1 %v871_v0  ;;  %v607_v34 = vld [vmem:[%s993_s5] ss:$0 sm:$0xff]  ;;  %v770_v40 = vld [vmem:[#allocation6 + $0xb0] ss:$12 sps:$4 sm:$0xff]   ;;  %v794_v48 = vld [vmem:[#allocation6 + $0x20] ss:$12 sps:$4 sm:$0xff]  }
  0x2a   :  { %v774_v43 = vld [vmem:[#allocation6 + $0x98] ss:$12 sps:$4 sm:$0xff]   ;;  %v786_v46 = vld [vmem:[#allocation6 + $0x50] ss:$12 sps:$4 sm:$0xff]   ;;  %v795_v50 = vld [vmem:[#allocation6] ss:$12 sps:$4 sm:$0xff]  }
  0x2b   :  { %v790_v47 = vld [vmem:[#allocation6 + $0x38] ss:$12 sps:$4 sm:$0xff]   ;;  %v798_v51 = vld [vmem:[#allocation6 + $0x8] ss:$12 sps:$4 sm:$0xff]  }
  0x2c   :  { %686 = vmatpush3.bf16.msra.mxu0 %v754_v6  ;;  %706 = vmatpush3.bf16.msra.mxu1 %v762_v11  ;;  %v545_v53 = vld [vmem:[%s989_s1] sm:$0xff] }
  0x2d   :  { %687 = vmatprep.subr.bf16.mxu0 %v871_v0  ;;  %707 = vmatprep.subr.bf16.mxu1 %v871_v0  ;;  %vm546_vm2 = vcmp.eq.s32.totalorder %v545_v53, 0  ;;  %vm559_vm3 = vcmp.eq.s32.totalorder %v545_v53, 1  ;;  %vm572_vm4 = vcmp.eq.s32.totalorder %v545_v53, 2  ;;  %v616_v57 = vld [vmem:[%s993_s5 + $0x1] ss:$0 sm:$0xff] }
  0x2e   :  { %v547_v54 = vsel %vm546_vm2, 1, %v873_v52  ;;  %v573_v55 = vsel %vm572_vm4, 1, %v873_v52  ;;  %v560_v56 = vsel %vm559_vm3, 1, %v873_v52  ;;  %v650_v5 = vld [vmem:[%s990_s2 + $0x1] ss:$0 sm:$0xff] }
  0x2f   :  { %549 = vperm.xlu0 %749, %v547_v54   ;;  %575 = vperm.xlu1 %750, %v573_v55   ;;  %v651_v7 = vld [vmem:[%s990_s2 + $0x2] ss:$0 sm:$0xff] }
  0x30   :  { %688 = vmatpush3.bf16.msra.mxu0 %v755_v8  ;;  %708 = vmatpush3.bf16.msra.mxu1 %v763_v13  ;;  %v319_v13 = vld [vmem:[%s993_s5 + $0x2] sm:$0x7] }
  0x31   :  { %689 = vmatprep.subr.bf16.mxu0 %v871_v0  ;;  %709 = vmatprep.subr.bf16.mxu1 %v871_v0 }
  0x33   :  { %562 = vperm.xlu0 %749, %v560_v56  }
  0x34   :  { %690 = vmatpush3.bf16.msra.mxu0 %v756_v10  ;;  %710 = vmatpush3.bf16.msra.mxu1 %v764_v16  ;;  %v321_v10 = vlaneseq }
  0x35   :  { %691 = vmatprep.subr.bf16.mxu0 %v871_v0  ;;  %711 = vmatprep.subr.bf16.mxu1 %v871_v0 }
  0x36   :  { %v322_v11 = vshrl.u32 %v321_v10, 7 }
  0x38   :  { %692 = vmatpush3.bf16.msra.mxu0 %v757_v12  ;;  %712 = vmatpush3.bf16.msra.mxu1 %v765_v18  ;;  %v323_v12 = vsub.s32 0, %v322_v11  ;;  %v331_v15 = vsub.s32 2, %v322_v11 }
  0x39   :  { %693 = vmatprep.subr.bf16.mxu0 %v871_v0  ;;  %713 = vmatprep.subr.bf16.mxu1 %v871_v0 }
  0x3a   :  { %v324_v16 = vrot.slane %v319_v13, %v323_v12 }
  0x3c   :  { %694 = vmatpush3.bf16.msra.mxu0 %v758_v14  ;;  %714 = vmatpush3.bf16.msra.mxu1 %v766_v19  ;;  %v327_v14 = vsub.s32 1, %v322_v11  ;;  %v332_v19 = vrot.slane %v319_v13, %v331_v15 }
  0x3d   :  { %719 = vmatprep.subr.bf16.mxu1 %v871_v0  ;;  %464 = vmatprep.subr.bf16.mxu0 %v769_v21 }
  0x3f   :  { %696 = vmatmul.mubr.bf16.vlgmr.msra.gmra.mxu0 %v60_v17  ;;  %v328_v17 = vrot.slane %v319_v13, %v327_v14 }
  0x40   :  { %465 = vmatpush1.bf16.msra.mxu0 %v767_v20  ;;  %496 = vmatprep.mubr.bf16.mxu0 %v873_v52 }
  0x41   :  { %466 = vmatprep.subr.bf16.mxu0 %v773_v22 }
  0x44   :  { %467 = vmatpush1.bf16.msra.mxu0 %v771_v23 }
  0x45   :  { %468 = vmatprep.subr.bf16.mxu0 %v777_v24 }
  0x48   :  { %469 = vmatpush1.bf16.msra.mxu0 %v775_v25 }
  0x49   :  { %470 = vmatprep.subr.bf16.mxu0 %v781_v26 }
  0x4c   :  { %471 = vmatpush1.bf16.msra.mxu0 %v779_v27 }
  0x4d   :  { %472 = vmatprep.subr.bf16.mxu0 %v785_v28 }
  0x50   :  { %473 = vmatpush1.bf16.msra.mxu0 %v783_v29 }
  0x51   :  { %474 = vmatprep.subr.bf16.mxu0 %v789_v30 }
  0x54   :  { %475 = vmatpush1.bf16.msra.mxu0 %v787_v31 }
  0x55   :  { %476 = vmatprep.subr.bf16.mxu0 %v793_v32 }
  0x58   :  { %477 = vmatpush1.bf16.msra.mxu0 %v791_v33 }
  0x59   :  { %478 = vmatprep.subr.bf16.mxu0 %v797_v49 }
  0x5c   :  { %479 = vmatpush1.bf16.msra.mxu0 %v795_v50 }
  0xaa   :  { %v550_v1 = vpop.permute.xlu0 %549  ;;  %v576_v3 = vpop.permute.xlu1 %575 }
  0xab   :  { %vm551_vm5 = vcmp.eq.s32.totalorder %v550_v1, 1  ;;  %vm577_vm6 = vcmp.eq.s32.totalorder %v576_v3, 1 }
  0xae   :  { %v563_v6 = vpop.permute.xlu0 %562 }
  0xaf   :  { %vm564_vm7 = vcmp.eq.s32.totalorder %v563_v6, 1 }
  0xff   :  { %v166_v35 = vpop.f32.mrf.mxu0 }
 0x100   :  { %v167_v36 = vadd.f32 %v607_v34, %v166_v35 }
 0x101   :  { %v697_v37 = vpop.f32.mrf.mxu0 }
 0x102   :  { %v172_v38 = vmax.f32 %v167_v36, 0.0 }
 0x103   :  { %v169_v39 = vpop.f32.mrf.mxu0 }
 0x104   :  { %v173_v41 = vpack.c.bf16 %v172_v38, %v172_v38 }
 0x105   :  { %v698_v42 = vpop.f32.mrf.mxu0 }
 0x106   :  { %716 = vmatmul.mubr.bf16.vlgmr.msra.gmra.mxu1 %v173_v41 }
 0x107   :  { %720 = vmatpush3.bf16.msra.mxu1 %v770_v40  ;;  %735 = vmatprep.mubr.msk.bf16.mxu1 %vm872_vm0, %v871_v0 }
 0x108   :  { %721 = vmatprep.subr.bf16.mxu1 %v871_v0 }
 0x10b   :  { %722 = vmatpush3.bf16.msra.mxu1 %v774_v43 }
 0x10c   :  { %723 = vmatprep.subr.bf16.mxu1 %v871_v0 }
 0x10f   :  { %724 = vmatpush3.bf16.msra.mxu1 %v778_v44 }
 0x110   :  { %725 = vmatprep.subr.bf16.mxu1 %v871_v0 }
 0x113   :  { %726 = vmatpush3.bf16.msra.mxu1 %v782_v45 }
 0x114   :  { %727 = vmatprep.subr.bf16.mxu1 %v871_v0 }
 0x117   :  { %728 = vmatpush3.bf16.msra.mxu1 %v786_v46 }
 0x118   :  { %729 = vmatprep.subr.bf16.mxu1 %v871_v0 }
 0x11b   :  { %730 = vmatpush3.bf16.msra.mxu1 %v790_v47 }
 0x11c   :  { %731 = vmatprep.subr.bf16.mxu1 %v871_v0 }
 0x11f   :  { %732 = vmatpush3.bf16.msra.mxu1 %v794_v48 }
 0x120   :  { %733 = vmatprep.subr.bf16.mxu1 %v871_v0  ;;  %v649_v0 = vld [vmem:[%s990_s2] ss:$0 sm:$0xff]  ;;  %s874_s2 = smov [#allocation8]  }
 0x121   :  { %v558_v4 = vsel %vm551_vm5, %v649_v0, 0.0  ;;  %s593_s29 = sshll.u32 %s874_s2, 4  ;;  %s594_s29 = int_to_ptr.vmem [resolvable:$true] %s593_s29 }
 0x122   :  { %v571_v8 = vsel %vm564_vm7, %v650_v5, %v558_v4  ;;  %s839_s5 = scalar_lea.vmem %s594_s29, 128  ;;  %p844_p11 = scmp.lt.s32.totalorder %s594_s29, %s594_s29 }
 0x123   :  { %734 = vmatpush3.bf16.msra.mxu1 %v798_v51  ;;  %v584_v9 = vsel %vm577_vm6, %v651_v7, %v571_v8  ;;  %p840_p10 = scmp.ne.s32.totalorder %s594_s29, %s839_s5  ;;  %p845_p12 = scmp.lt.s32.totalorder %s839_s5, %s839_s5 }
 0x124   :  { %586 = vst [vmem:[%s995_s7] sm:$0xff] %v584_v9 }
 0x125   :  { %p846_p13 = por %p845_p12, %p844_p11 }
 0x127   :  { %p847_p0 = pnand %p846_p13, %p840_p10 }
 0x1c6   :  { %v279_v58 = vpop.f32.mrf.mxu1 }
 0x1c7   :  { %v280_v59 = vadd.f32 %v616_v57, %v279_v58 }
 0x1c8   :  { %v717_v60 = vpop.f32.mrf.mxu1 }
 0x1c9   :  { %v285_v61 = vmax.f32 %v280_v59, 0.0 }
 0x1ca   :  { %v282_v62 = vpop.f32.mrf.mxu1 }
 0x1cb   :  { %v286_v63 = vpack.c.bf16 %v285_v61, %v285_v61 }
 0x1cc   :  { %v718_v2 = vpop.f32.mrf.mxu1 }
 0x1cd   :  { %497 = vmatmul.mubr.bf16.vlgmr.msra.gmra.mxu0 %v286_v63  ;;  %736 = vmatmul.mubr.bf16.vlgmr.msra.gmra.mxu1 %v286_v63 }
 0x28d   :  { %v498_v18 = vpop.f32.mrf.mxu0  ;;  %v539_v20 = vpop.f32.mrf.mxu1 }
 0x28e   :  { %v499_v21 = vadd.f32 %v498_v18, %v324_v16  ;;  %v540_v26 = vadd.f32 %v539_v20, %v332_v19 }
 0x28f   :  { %v500_v22 = vpop.f32.mrf.mxu0  ;;  %v737_v23 = vpop.f32.mrf.mxu1 }
 0x290   :  { %v552_v24 = vsel %vm551_vm5, %v499_v21, 0.0  ;;  %v501_v25 = vadd.f32 %v500_v22, %v328_v17 }
 0x291   :  { %v502_v27 = vpop.f32.mrf.mxu0  ;;  %v542_v28 = vpop.f32.mrf.mxu1 }
 0x292   :  { %v565_v29 = vsel %vm564_vm7, %v501_v25, %v552_v24 }
 0x293   :  { %v503_v30 = vpop.f32.mrf.mxu0  ;;  %v738_v31 = vpop.f32.mrf.mxu1  ;;  %v578_v32 = vsel %vm577_vm6, %v540_v26, %v565_v29 }
 0x294   :  { %585 = vst [vmem:[#allocation8] sm:$0xff] %v578_v32 }
 0x295   :  { %850 = shalt.err (!%p847_p0)
}
 0x296   :  { %596 = dma.vmem_to_hbm [thread:$0]  %s594_s29, 128, %s994_s6, [#allocation5]  }
 0x297   :  { %863 = dma.done.wait [#allocation5], 128  }
 0x298   :  { %864 = vsyncadd [#allocation5], 4294967168 }
 0x299   :  { %604 = vsyncpa [#allocation4], 1 }
 0x29a   :  { %605 = vsyncpa [#allocation7], 1 }
 0x29b   :  { %606 = vsyncpa [#allocation5], 1 }

</bundles_post_ra>
